<compile_context>
chip_gen: v6e
topology: v6e:2x2x1
jax: 0.10.0
libtpu: 0.0.40
codegen_flags: <defaults>
</compile_context>

<pallas_src>
import math
import functools

import jax
import jax.numpy as jnp
from jax.experimental import pallas as pl
from jax.experimental.pallas import tpu as pltpu

# ---------------- config (small, consistent with the module) ----------------
B, T = 2, 8
N_EMBD = 32
N_HEAD = 4
HEAD_DIM = N_EMBD // N_HEAD          # 8
DROPOUT = 0.0                        # eval mode: dropout layers are identity
USE_ROPE = True
ROPE_BASE = 10000.0
NEG_INF = -1e30                      # finite "masked" value (NaN-safe)


# ----------------------------- fused Pallas kernel ---------------------------
def _fused_attn_kernel(x_ref, w_attn_ref, b_attn_ref, w_proj_ref, b_proj_ref,
                       cos_ref, sin_ref, mask_ref, o_ref, *, n_head, use_rope):
    """Single grid step: whole (B*T, C) slab, all heads, c_attn..c_proj fused.

    When use_rope, w_attn was pre-transformed offline so its output columns are
    [q, q_swap, k, k_swap, v]: q/k are in per-head split-half (de-interleaved)
    layout with 1/sqrt(head_dim) folded into q; *_swap are the rotate-half
    companions with the sign already folded in, so RoPE is just
    q_rot = q*cos + q_swap*sin (pure element-wise, no lane shuffles).
    """
    x = x_ref[...]                                       # (BT, C)
    BT, C = x.shape
    hd = C // n_head

    # ---- c_attn (one MXU push) ----
    qkv = (jnp.dot(x, w_attn_ref[...], preferred_element_type=jnp.float32)
           + b_attn_ref[...])                            # (BT, 5C) or (BT, 3C)

    if use_rope:
        q_c = qkv[:, 0 * C:1 * C]
        q_s = qkv[:, 1 * C:2 * C]
        k_c = qkv[:, 2 * C:3 * C]
        k_s = qkv[:, 3 * C:4 * C]
        v   = qkv[:, 4 * C:5 * C]                        # original per-head layout
        cos = cos_ref[...]                               # (BT, C)
        sin = sin_ref[...]
        q = q_c * cos + q_s * sin                        # RoPE: VPU only
        k = k_c * cos + k_s * sin
    else:
        q = qkv[:, 0:C]                                  # pre-scaled
        k = qkv[:, C:2 * C]
        v = qkv[:, 2 * C:3 * C]

    # block-diagonal causal bias (0 valid / NEG_INF masked), shared by all heads
    bias = mask_ref[...]                                 # (BT, BT)

    # ---- per-head attention + per-head projection accumulation ----
    acc = None
    for h in range(n_head):
        sl = slice(h * hd, (h + 1) * hd)
        # one K=hd score matmul per head (contract last dims; no explicit .T)
        s = jax.lax.dot_general(q[:, sl], k[:, sl],
                                (((1,), (1,)), ((), ())),
                                preferred_element_type=jnp.float32)  # (BT, BT)
        s = s + bias
        m = jnp.max(s, axis=-1, keepdims=True)
        p = jnp.exp(s - m)                               # masked entries -> 0
        l = jnp.sum(p, axis=-1, keepdims=True)
        # exact reciprocal keeps 1e-4 agreement; approx=True is the scale-up variant
        att = p * pl.reciprocal(l, approx=False)
        y_h = jnp.dot(att, v[:, sl], preferred_element_type=jnp.float32)      # (BT, hd)
        contrib = jnp.dot(y_h, w_proj_ref[sl, :],
                          preferred_element_type=jnp.float32)                 # (BT, C)
        acc = contrib if acc is None else acc + contrib  # no lane concat

    # ---- lane-dense (BT, C) store ----
    o_ref[...] = acc + b_proj_ref[...]


# ------------------------------- glue / wrapper ------------------------------
def rope_cache(seq_len, hd, base=ROPE_BASE):
    theta = jnp.exp(
        jnp.arange(0, hd, 2, dtype=jnp.float32) * (-math.log(base) / hd))
    idx_theta = jnp.arange(seq_len, dtype=jnp.float32)[:, None] * theta[None, :]
    return jnp.cos(idx_theta), jnp.sin(idx_theta)        # each (T, hd//2)


def prep_params(params, *, use_rope=USE_ROPE):
    """One-time offline transform of c_attn:
    - per-head split-half (de-interleave) permutation of q/k columns,
    - extra 'rotate-half with sign' companion columns for q/k (q_swap, k_swap),
    - 1/sqrt(head_dim) folded into all q columns."""
    C, H, hd = N_EMBD, N_HEAD, HEAD_DIM
    h2 = hd // 2
    scale = 1.0 / math.sqrt(hd)
    w_attn, b_attn = params["w_attn"], params["b_attn"]

    wq, wk, wv = w_attn[:, :C], w_attn[:, C:2 * C], w_attn[:, 2 * C:]
    bq, bk, bv = b_attn[:C], b_attn[C:2 * C], b_attn[2 * C:]

    if not use_rope:
        return {
            "w_attn": jnp.concatenate([wq * scale, wk, wv], axis=1),
            "b_attn": jnp.concatenate([bq * scale, bk, bv]).reshape(1, 3 * C),
            "w_proj": params["w_proj"],
            "b_proj": params["b_proj"].reshape(1, C),
        }

    # per-head split-half layout: head h columns = [evens_h | odds_h]
    idx = jnp.arange(C).reshape(H, hd)
    perm = jnp.concatenate([idx[:, 0::2], idx[:, 1::2]], axis=1).reshape(-1)

    wq_p, bq_p = wq[:, perm], bq[perm]
    wk_p, bk_p = wk[:, perm], bk[perm]

    # rotate-half companion with sign folded: even-half col c -> -(col c+h2),
    # odd-half col c -> +(col c-h2)
    col = jnp.arange(C)
    even_half = (col % hd) < h2
    swap_idx = jnp.where(even_half, col + h2, col - h2)
    sign = jnp.where(even_half, -1.0, 1.0).astype(jnp.float32)

    wq_s, bq_s = wq_p[:, swap_idx] * sign[None, :], bq_p[swap_idx] * sign
    wk_s, bk_s = wk_p[:, swap_idx] * sign[None, :], bk_p[swap_idx] * sign

    # fold the attention scale into q (commutes exactly with RoPE rotation)
    wq_p, bq_p = wq_p * scale, bq_p * scale
    wq_s, bq_s = wq_s * scale, bq_s * scale

    return {
        "w_attn": jnp.concatenate([wq_p, wq_s, wk_p, wk_s, wv], axis=1),   # (C, 5C)
        "b_attn": jnp.concatenate([bq_p, bq_s, bk_p, bk_s, bv]).reshape(1, 5 * C),
        "w_proj": params["w_proj"],
        "b_proj": params["b_proj"].reshape(1, C),
    }


def causal_self_attention(x, prepped, *, use_rope=USE_ROPE):
    Bx, Tx, C = x.shape
    BT = Bx * Tx
    hd = HEAD_DIM
    h2 = hd // 2

    x2 = x.reshape(BT, C)                                # contiguous, free reshape

    if use_rope:
        cos, sin = rope_cache(Tx, hd)                    # (T, hd//2)
        pair = (jnp.arange(C) % hd) % h2                 # pair index per column
        cos_full = jnp.tile(cos[:, pair], (Bx, 1))       # (BT, C)
        sin_full = jnp.tile(sin[:, pair], (Bx, 1))
    else:
        cos_full = jnp.zeros((BT, C), jnp.float32)       # unused by the kernel
        sin_full = jnp.zeros((BT, C), jnp.float32)

    # block-diagonal causal additive bias (keeps the two batch rows independent)
    r = jnp.arange(BT)[:, None]
    c = jnp.arange(BT)[None, :]
    valid = (r // Tx == c // Tx) & (c <= r)
    mask_bias = jnp.where(valid, 0.0, NEG_INF).astype(jnp.float32)

    n_qkv = prepped["w_attn"].shape[1]                   # 5C (rope) or 3C

    kernel = functools.partial(_fused_attn_kernel, n_head=N_HEAD,
                               use_rope=use_rope)
    out = pl.pallas_call(
        kernel,
        out_shape=jax.ShapeDtypeStruct((BT, C), jnp.float32),
        grid=(1,),                                       # single step: no per-batch loop
        in_specs=[
            pl.BlockSpec((BT, C), lambda i: (0, 0)),         # x slab
            pl.BlockSpec((C, n_qkv), lambda i: (0, 0)),      # w_attn (prepped)
            pl.BlockSpec((1, n_qkv), lambda i: (0, 0)),      # b_attn (prepped)
            pl.BlockSpec((C, C), lambda i: (0, 0)),          # w_proj
            pl.BlockSpec((1, C), lambda i: (0, 0)),          # b_proj
            pl.BlockSpec((BT, C), lambda i: (0, 0)),         # cos (full width, batch-tiled)
            pl.BlockSpec((BT, C), lambda i: (0, 0)),         # sin
            pl.BlockSpec((BT, BT), lambda i: (0, 0)),        # causal bias
        ],
        out_specs=pl.BlockSpec((BT, C), lambda i: (0, 0)),
        compiler_params=pltpu.CompilerParams(
            dimension_semantics=("arbitrary",)),
    )(x2, prepped["w_attn"], prepped["b_attn"], prepped["w_proj"],
      prepped["b_proj"], cos_full, sin_full, mask_bias)
    return out.reshape(Bx, Tx, C)


# ------------------------- pure-JAX reference (check) ------------------------
def reference(x, params):
    Bx, Tx, C = x.shape
    qkv = x @ params["w_attn"] + params["b_attn"]
    q, k, v = jnp.split(qkv, 3, axis=-1)

    def heads(t):
        return t.reshape(Bx, Tx, N_HEAD, HEAD_DIM)

    q, k, v = heads(q), heads(k), heads(v)

    cos, sin = rope_cache(Tx, HEAD_DIM)

    def apply_rope(t):   # interleaved pairs, exactly like the PyTorch module
        ts = t.reshape(Bx, Tx, N_HEAD, HEAD_DIM // 2, 2)
        c = cos[None, :, None, :]
        s = sin[None, :, None, :]
        o0 = ts[..., 0] * c - ts[..., 1] * s
        o1 = ts[..., 1] * c + ts[..., 0] * s
        return jnp.stack([o0, o1], axis=-1).reshape(Bx, Tx, N_HEAD, HEAD_DIM)

    if USE_ROPE:
        q, k = apply_rope(q), apply_rope(k)

    q = q.transpose(0, 2, 1, 3)
    k = k.transpose(0, 2, 1, 3)
    v = v.transpose(0, 2, 1, 3)

    att = jnp.einsum("bhqd,bhkd->bhqk", q, k) / math.sqrt(HEAD_DIM)
    mask = jnp.tril(jnp.ones((Tx, Tx), dtype=bool))
    att = jnp.where(mask[None, None], att, -jnp.inf)
    att = jax.nn.softmax(att, axis=-1)
    y = jnp.einsum("bhqk,bhkd->bhqd", att, v)
    y = y.transpose(0, 2, 1, 3).reshape(Bx, Tx, C)
    return y @ params["w_proj"] + params["b_proj"]


# ----------------------------------- main ------------------------------------
if __name__ == "__main__":
    key = jax.random.PRNGKey(0)
    kx, k1, k2, k3, k4 = jax.random.split(key, 5)

    # Deterministic synthetic parameters (nn.Linear weights stored transposed
    # to (in, out)).
    params = {
        "w_attn": 0.02 * jax.random.normal(k1, (N_EMBD, 3 * N_EMBD), jnp.float32),
        "b_attn": 0.01 * jax.random.normal(k2, (3 * N_EMBD,), jnp.float32),
        "w_proj": 0.02 * jax.random.normal(k3, (N_EMBD, N_EMBD), jnp.float32),
        "b_proj": 0.01 * jax.random.normal(k4, (N_EMBD,), jnp.float32),
    }

    x = jax.random.normal(kx, (B, T, N_EMBD), jnp.float32)

    prepped = prep_params(params)
    out = causal_self_attention(x, prepped)
    out = jax.block_until_ready(out)

    ref = reference(x, params)
    assert out.shape == (B, T, N_EMBD)
    assert jnp.allclose(out, ref, atol=1e-4, rtol=1e-4), (
        "Pallas output mismatch vs reference")

    # TODO(synk): training-mode dropout (attn/resid) and the optional padding
    # mask / return_attn paths are not implemented; eval (p=0, mask=None) only.
    print("KERNEL_OK")
</pallas_src>

<mosaic_0001>
module attributes {stable_mosaic.version = 11 : i64} {
  func.func @_fused_attn_kernel(%arg0: i32, %arg1: memref<16x32xf32, #tpu.memory_space<vmem>>, %arg2: memref<32x160xf32, #tpu.memory_space<vmem>>, %arg3: memref<1x160xf32, #tpu.memory_space<vmem>>, %arg4: memref<32x32xf32, #tpu.memory_space<vmem>>, %arg5: memref<1x32xf32, #tpu.memory_space<vmem>>, %arg6: memref<16x32xf32, #tpu.memory_space<vmem>>, %arg7: memref<16x32xf32, #tpu.memory_space<vmem>>, %arg8: memref<16x16xf32, #tpu.memory_space<vmem>>, %arg9: memref<16x32xf32, #tpu.memory_space<vmem>>) attributes {dimension_semantics = [#tpu.dimension_semantics<arbitrary>], iteration_bounds = array<i64: 1>, scalar_prefetch = 0 : i64, scratch_operands = 0 : i64, tpu.core_type = #tpu.core_type<tc>, window_params = [{pipeline_mode = #tpu.pipeline_mode<synchronous>, transform_indices = @transform_0, window_bounds = array<i64: 16, 32>}, {pipeline_mode = #tpu.pipeline_mode<synchronous>, transform_indices = @transform_1, window_bounds = array<i64: 32, 160>}, {pipeline_mode = #tpu.pipeline_mode<synchronous>, transform_indices = @transform_2, window_bounds = array<i64: 1, 160>}, {pipeline_mode = #tpu.pipeline_mode<synchronous>, transform_indices = @transform_3, window_bounds = array<i64: 32, 32>}, {pipeline_mode = #tpu.pipeline_mode<synchronous>, transform_indices = @transform_4, window_bounds = array<i64: 1, 32>}, {pipeline_mode = #tpu.pipeline_mode<synchronous>, transform_indices = @transform_5, window_bounds = array<i64: 16, 32>}, {pipeline_mode = #tpu.pipeline_mode<synchronous>, transform_indices = @transform_6, window_bounds = array<i64: 16, 32>}, {pipeline_mode = #tpu.pipeline_mode<synchronous>, transform_indices = @transform_7, window_bounds = array<i64: 16, 16>}, {pipeline_mode = #tpu.pipeline_mode<synchronous>, transform_indices = @transform_8, window_bounds = array<i64: 16, 32>}]} {
    %c0 = arith.constant 0 : index
    %c0_0 = arith.constant 0 : index
    %0 = vector.load %arg1[%c0, %c0_0] : memref<16x32xf32, #tpu.memory_space<vmem>>, vector<16x32xf32>
    %c0_1 = arith.constant 0 : index
    %c0_2 = arith.constant 0 : index
    %1 = vector.load %arg2[%c0_1, %c0_2] : memref<32x160xf32, #tpu.memory_space<vmem>>, vector<32x160xf32>
    %cst = arith.constant dense<0.000000e+00> : vector<16x160xf32>
    %2 = tpu.matmul %0, %1, %cst {dimension_numbers = #tpu.dot_dimension_numbers<[1], [0], [0], [1], [0, 0, 1, 1], [], []>} : vector<16x32xf32>, vector<32x160xf32>, vector<16x160xf32> -> vector<16x160xf32>
    %c0_3 = arith.constant 0 : index
    %c0_4 = arith.constant 0 : index
    %3 = vector.load %arg3[%c0_3, %c0_4] : memref<1x160xf32, #tpu.memory_space<vmem>>, vector<1x160xf32>
    %4 = vector.broadcast %3 : vector<1x160xf32> to vector<16x160xf32>
    %5 = arith.addf %2, %4 : vector<16x160xf32>
    %6 = vector.extract_strided_slice %5 {offsets = [0, 0], sizes = [16, 32], strides = [1, 1]} : vector<16x160xf32> to vector<16x32xf32>
    %7 = vector.extract_strided_slice %5 {offsets = [0, 32], sizes = [16, 32], strides = [1, 1]} : vector<16x160xf32> to vector<16x32xf32>
    %8 = vector.extract_strided_slice %5 {offsets = [0, 64], sizes = [16, 32], strides = [1, 1]} : vector<16x160xf32> to vector<16x32xf32>
    %9 = vector.extract_strided_slice %5 {offsets = [0, 96], sizes = [16, 32], strides = [1, 1]} : vector<16x160xf32> to vector<16x32xf32>
    %10 = vector.extract_strided_slice %5 {offsets = [0, 128], sizes = [16, 32], strides = [1, 1]} : vector<16x160xf32> to vector<16x32xf32>
    %c0_5 = arith.constant 0 : index
    %c0_6 = arith.constant 0 : index
    %11 = vector.load %arg6[%c0_5, %c0_6] : memref<16x32xf32, #tpu.memory_space<vmem>>, vector<16x32xf32>
    %c0_7 = arith.constant 0 : index
    %c0_8 = arith.constant 0 : index
    %12 = vector.load %arg7[%c0_7, %c0_8] : memref<16x32xf32, #tpu.memory_space<vmem>>, vector<16x32xf32>
    %13 = arith.mulf %6, %11 : vector<16x32xf32>
    %14 = arith.mulf %7, %12 : vector<16x32xf32>
    %15 = arith.addf %13, %14 : vector<16x32xf32>
    %16 = arith.mulf %8, %11 : vector<16x32xf32>
    %17 = arith.mulf %9, %12 : vector<16x32xf32>
    %18 = arith.addf %16, %17 : vector<16x32xf32>
    %c0_9 = arith.constant 0 : index
    %c0_10 = arith.constant 0 : index
    %19 = vector.load %arg8[%c0_9, %c0_10] : memref<16x16xf32, #tpu.memory_space<vmem>>, vector<16x16xf32>
    %20 = vector.extract_strided_slice %15 {offsets = [0, 0], sizes = [16, 8], strides = [1, 1]} : vector<16x32xf32> to vector<16x8xf32>
    %21 = vector.extract_strided_slice %18 {offsets = [0, 0], sizes = [16, 8], strides = [1, 1]} : vector<16x32xf32> to vector<16x8xf32>
    %cst_11 = arith.constant dense<0.000000e+00> : vector<16x16xf32>
    %22 = tpu.matmul %20, %21, %cst_11 {dimension_numbers = #tpu.dot_dimension_numbers<[1], [1], [0], [0], [0, 0, 1, 0], [], []>} : vector<16x8xf32>, vector<16x8xf32>, vector<16x16xf32> -> vector<16x16xf32>
    %23 = arith.addf %22, %19 : vector<16x16xf32>
    %cst_12 = arith.constant dense<0xFF800000> : vector<16xf32>
    %24 = vector.multi_reduction <maximumf>, %23, %cst_12 [1] : vector<16x16xf32> to vector<16xf32>
    %25 = vector.shape_cast %24 : vector<16xf32> to vector<16x1xf32>
    %26 = vector.broadcast %25 : vector<16x1xf32> to vector<16x16xf32>
    %27 = arith.subf %23, %26 : vector<16x16xf32>
    %28 = math.exp %27 : vector<16x16xf32>
    %cst_13 = arith.constant dense<0.000000e+00> : vector<16xf32>
    %29 = vector.multi_reduction <add>, %28, %cst_13 [1] : vector<16x16xf32> to vector<16xf32>
    %30 = vector.shape_cast %29 : vector<16xf32> to vector<16x1xf32>
    %31 = tpu.reciprocal %30 : vector<16x1xf32> -> vector<16x1xf32>
    %32 = vector.broadcast %31 : vector<16x1xf32> to vector<16x16xf32>
    %33 = arith.mulf %28, %32 : vector<16x16xf32>
    %34 = vector.extract_strided_slice %10 {offsets = [0, 0], sizes = [16, 8], strides = [1, 1]} : vector<16x32xf32> to vector<16x8xf32>
    %cst_14 = arith.constant dense<0.000000e+00> : vector<16x8xf32>
    %35 = tpu.matmul %33, %34, %cst_14 {dimension_numbers = #tpu.dot_dimension_numbers<[1], [0], [0], [1], [0, 0, 1, 1], [], []>} : vector<16x16xf32>, vector<16x8xf32>, vector<16x8xf32> -> vector<16x8xf32>
    %c0_15 = arith.constant 0 : index
    %c0_16 = arith.constant 0 : index
    %36 = vector.load %arg4[%c0_15, %c0_16] : memref<32x32xf32, #tpu.memory_space<vmem>>, vector<8x32xf32>
    %cst_17 = arith.constant dense<0.000000e+00> : vector<16x32xf32>
    %37 = tpu.matmul %35, %36, %cst_17 {dimension_numbers = #tpu.dot_dimension_numbers<[1], [0], [0], [1], [0, 0, 1, 1], [], []>} : vector<16x8xf32>, vector<8x32xf32>, vector<16x32xf32> -> vector<16x32xf32>
    %38 = vector.extract_strided_slice %15 {offsets = [0, 8], sizes = [16, 8], strides = [1, 1]} : vector<16x32xf32> to vector<16x8xf32>
    %39 = vector.extract_strided_slice %18 {offsets = [0, 8], sizes = [16, 8], strides = [1, 1]} : vector<16x32xf32> to vector<16x8xf32>
    %cst_18 = arith.constant dense<0.000000e+00> : vector<16x16xf32>
    %40 = tpu.matmul %38, %39, %cst_18 {dimension_numbers = #tpu.dot_dimension_numbers<[1], [1], [0], [0], [0, 0, 1, 0], [], []>} : vector<16x8xf32>, vector<16x8xf32>, vector<16x16xf32> -> vector<16x16xf32>
    %41 = arith.addf %40, %19 : vector<16x16xf32>
    %cst_19 = arith.constant dense<0xFF800000> : vector<16xf32>
    %42 = vector.multi_reduction <maximumf>, %41, %cst_19 [1] : vector<16x16xf32> to vector<16xf32>
    %43 = vector.shape_cast %42 : vector<16xf32> to vector<16x1xf32>
    %44 = vector.broadcast %43 : vector<16x1xf32> to vector<16x16xf32>
    %45 = arith.subf %41, %44 : vector<16x16xf32>
    %46 = math.exp %45 : vector<16x16xf32>
    %cst_20 = arith.constant dense<0.000000e+00> : vector<16xf32>
    %47 = vector.multi_reduction <add>, %46, %cst_20 [1] : vector<16x16xf32> to vector<16xf32>
    %48 = vector.shape_cast %47 : vector<16xf32> to vector<16x1xf32>
    %49 = tpu.reciprocal %48 : vector<16x1xf32> -> vector<16x1xf32>
    %50 = vector.broadcast %49 : vector<16x1xf32> to vector<16x16xf32>
    %51 = arith.mulf %46, %50 : vector<16x16xf32>
    %52 = vector.extract_strided_slice %10 {offsets = [0, 8], sizes = [16, 8], strides = [1, 1]} : vector<16x32xf32> to vector<16x8xf32>
    %cst_21 = arith.constant dense<0.000000e+00> : vector<16x8xf32>
    %53 = tpu.matmul %51, %52, %cst_21 {dimension_numbers = #tpu.dot_dimension_numbers<[1], [0], [0], [1], [0, 0, 1, 1], [], []>} : vector<16x16xf32>, vector<16x8xf32>, vector<16x8xf32> -> vector<16x8xf32>
    %c8 = arith.constant 8 : index
    %c0_22 = arith.constant 0 : index
    %54 = vector.load %arg4[%c8, %c0_22] : memref<32x32xf32, #tpu.memory_space<vmem>>, vector<8x32xf32>
    %cst_23 = arith.constant dense<0.000000e+00> : vector<16x32xf32>
    %55 = tpu.matmul %53, %54, %cst_23 {dimension_numbers = #tpu.dot_dimension_numbers<[1], [0], [0], [1], [0, 0, 1, 1], [], []>} : vector<16x8xf32>, vector<8x32xf32>, vector<16x32xf32> -> vector<16x32xf32>
    %56 = arith.addf %37, %55 : vector<16x32xf32>
    %57 = vector.extract_strided_slice %15 {offsets = [0, 16], sizes = [16, 8], strides = [1, 1]} : vector<16x32xf32> to vector<16x8xf32>
    %58 = vector.extract_strided_slice %18 {offsets = [0, 16], sizes = [16, 8], strides = [1, 1]} : vector<16x32xf32> to vector<16x8xf32>
    %cst_24 = arith.constant dense<0.000000e+00> : vector<16x16xf32>
    %59 = tpu.matmul %57, %58, %cst_24 {dimension_numbers = #tpu.dot_dimension_numbers<[1], [1], [0], [0], [0, 0, 1, 0], [], []>} : vector<16x8xf32>, vector<16x8xf32>, vector<16x16xf32> -> vector<16x16xf32>
    %60 = arith.addf %59, %19 : vector<16x16xf32>
    %cst_25 = arith.constant dense<0xFF800000> : vector<16xf32>
    %61 = vector.multi_reduction <maximumf>, %60, %cst_25 [1] : vector<16x16xf32> to vector<16xf32>
    %62 = vector.shape_cast %61 : vector<16xf32> to vector<16x1xf32>
    %63 = vector.broadcast %62 : vector<16x1xf32> to vector<16x16xf32>
    %64 = arith.subf %60, %63 : vector<16x16xf32>
    %65 = math.exp %64 : vector<16x16xf32>
    %cst_26 = arith.constant dense<0.000000e+00> : vector<16xf32>
    %66 = vector.multi_reduction <add>, %65, %cst_26 [1] : vector<16x16xf32> to vector<16xf32>
    %67 = vector.shape_cast %66 : vector<16xf32> to vector<16x1xf32>
    %68 = tpu.reciprocal %67 : vector<16x1xf32> -> vector<16x1xf32>
    %69 = vector.broadcast %68 : vector<16x1xf32> to vector<16x16xf32>
    %70 = arith.mulf %65, %69 : vector<16x16xf32>
    %71 = vector.extract_strided_slice %10 {offsets = [0, 16], sizes = [16, 8], strides = [1, 1]} : vector<16x32xf32> to vector<16x8xf32>
    %cst_27 = arith.constant dense<0.000000e+00> : vector<16x8xf32>
    %72 = tpu.matmul %70, %71, %cst_27 {dimension_numbers = #tpu.dot_dimension_numbers<[1], [0], [0], [1], [0, 0, 1, 1], [], []>} : vector<16x16xf32>, vector<16x8xf32>, vector<16x8xf32> -> vector<16x8xf32>
    %c16 = arith.constant 16 : index
    %c0_28 = arith.constant 0 : index
    %73 = vector.load %arg4[%c16, %c0_28] : memref<32x32xf32, #tpu.memory_space<vmem>>, vector<8x32xf32>
    %cst_29 = arith.constant dense<0.000000e+00> : vector<16x32xf32>
    %74 = tpu.matmul %72, %73, %cst_29 {dimension_numbers = #tpu.dot_dimension_numbers<[1], [0], [0], [1], [0, 0, 1, 1], [], []>} : vector<16x8xf32>, vector<8x32xf32>, vector<16x32xf32> -> vector<16x32xf32>
    %75 = arith.addf %56, %74 : vector<16x32xf32>
    %76 = vector.extract_strided_slice %15 {offsets = [0, 24], sizes = [16, 8], strides = [1, 1]} : vector<16x32xf32> to vector<16x8xf32>
    %77 = vector.extract_strided_slice %18 {offsets = [0, 24], sizes = [16, 8], strides = [1, 1]} : vector<16x32xf32> to vector<16x8xf32>
    %cst_30 = arith.constant dense<0.000000e+00> : vector<16x16xf32>
    %78 = tpu.matmul %76, %77, %cst_30 {dimension_numbers = #tpu.dot_dimension_numbers<[1], [1], [0], [0], [0, 0, 1, 0], [], []>} : vector<16x8xf32>, vector<16x8xf32>, vector<16x16xf32> -> vector<16x16xf32>
    %79 = arith.addf %78, %19 : vector<16x16xf32>
    %cst_31 = arith.constant dense<0xFF800000> : vector<16xf32>
    %80 = vector.multi_reduction <maximumf>, %79, %cst_31 [1] : vector<16x16xf32> to vector<16xf32>
    %81 = vector.shape_cast %80 : vector<16xf32> to vector<16x1xf32>
    %82 = vector.broadcast %81 : vector<16x1xf32> to vector<16x16xf32>
    %83 = arith.subf %79, %82 : vector<16x16xf32>
    %84 = math.exp %83 : vector<16x16xf32>
    %cst_32 = arith.constant dense<0.000000e+00> : vector<16xf32>
    %85 = vector.multi_reduction <add>, %84, %cst_32 [1] : vector<16x16xf32> to vector<16xf32>
    %86 = vector.shape_cast %85 : vector<16xf32> to vector<16x1xf32>
    %87 = tpu.reciprocal %86 : vector<16x1xf32> -> vector<16x1xf32>
    %88 = vector.broadcast %87 : vector<16x1xf32> to vector<16x16xf32>
    %89 = arith.mulf %84, %88 : vector<16x16xf32>
    %90 = vector.extract_strided_slice %10 {offsets = [0, 24], sizes = [16, 8], strides = [1, 1]} : vector<16x32xf32> to vector<16x8xf32>
    %cst_33 = arith.constant dense<0.000000e+00> : vector<16x8xf32>
    %91 = tpu.matmul %89, %90, %cst_33 {dimension_numbers = #tpu.dot_dimension_numbers<[1], [0], [0], [1], [0, 0, 1, 1], [], []>} : vector<16x16xf32>, vector<16x8xf32>, vector<16x8xf32> -> vector<16x8xf32>
    %c24 = arith.constant 24 : index
    %c0_34 = arith.constant 0 : index
    %92 = vector.load %arg4[%c24, %c0_34] : memref<32x32xf32, #tpu.memory_space<vmem>>, vector<8x32xf32>
    %cst_35 = arith.constant dense<0.000000e+00> : vector<16x32xf32>
    %93 = tpu.matmul %91, %92, %cst_35 {dimension_numbers = #tpu.dot_dimension_numbers<[1], [0], [0], [1], [0, 0, 1, 1], [], []>} : vector<16x8xf32>, vector<8x32xf32>, vector<16x32xf32> -> vector<16x32xf32>
    %94 = arith.addf %75, %93 : vector<16x32xf32>
    %c0_36 = arith.constant 0 : index
    %c0_37 = arith.constant 0 : index
    %95 = vector.load %arg5[%c0_36, %c0_37] : memref<1x32xf32, #tpu.memory_space<vmem>>, vector<1x32xf32>
    %96 = vector.broadcast %95 : vector<1x32xf32> to vector<16x32xf32>
    %97 = arith.addf %94, %96 : vector<16x32xf32>
    %c0_38 = arith.constant 0 : index
    %c0_39 = arith.constant 0 : index
    %98 = vector.load %arg9[%c0_38, %c0_39] : memref<16x32xf32, #tpu.memory_space<vmem>>, vector<16x32xf32>
    tpu.vector_store %arg9[%c0_38, %c0_39], %97 {strides = array<i32>} : memref<16x32xf32, #tpu.memory_space<vmem>>, vector<16x32xf32>,
    return
  }
  func.func @transform_0(%arg0: i32) -> (i32, i32) {
    %c0_i32 = arith.constant 0 : i32
    %c0_i32_0 = arith.constant 0 : i32
    %c0_i32_1 = arith.constant 0 : i32
    return %c0_i32, %c0_i32_0 : i32, i32
  }
  func.func @transform_1(%arg0: i32) -> (i32, i32) {
    %c0_i32 = arith.constant 0 : i32
    %c0_i32_0 = arith.constant 0 : i32
    %c0_i32_1 = arith.constant 0 : i32
    return %c0_i32, %c0_i32_0 : i32, i32
  }
  func.func @transform_2(%arg0: i32) -> (i32, i32) {
    %c0_i32 = arith.constant 0 : i32
    %c0_i32_0 = arith.constant 0 : i32
    %c0_i32_1 = arith.constant 0 : i32
    return %c0_i32, %c0_i32_0 : i32, i32
  }
  func.func @transform_3(%arg0: i32) -> (i32, i32) {
    %c0_i32 = arith.constant 0 : i32
    %c0_i32_0 = arith.constant 0 : i32
    %c0_i32_1 = arith.constant 0 : i32
    return %c0_i32, %c0_i32_0 : i32, i32
  }
  func.func @transform_4(%arg0: i32) -> (i32, i32) {
    %c0_i32 = arith.constant 0 : i32
    %c0_i32_0 = arith.constant 0 : i32
    %c0_i32_1 = arith.constant 0 : i32
    return %c0_i32, %c0_i32_0 : i32, i32
  }
  func.func @transform_5(%arg0: i32) -> (i32, i32) {
    %c0_i32 = arith.constant 0 : i32
    %c0_i32_0 = arith.constant 0 : i32
    %c0_i32_1 = arith.constant 0 : i32
    return %c0_i32, %c0_i32_0 : i32, i32
  }
  func.func @transform_6(%arg0: i32) -> (i32, i32) {
    %c0_i32 = arith.constant 0 : i32
    %c0_i32_0 = arith.constant 0 : i32
    %c0_i32_1 = arith.constant 0 : i32
    return %c0_i32, %c0_i32_0 : i32, i32
  }
  func.func @transform_7(%arg0: i32) -> (i32, i32) {
    %c0_i32 = arith.constant 0 : i32
    %c0_i32_0 = arith.constant 0 : i32
    %c0_i32_1 = arith.constant 0 : i32
    return %c0_i32, %c0_i32_0 : i32, i32
  }
  func.func @transform_8(%arg0: i32) -> (i32, i32) {
    %c0_i32 = arith.constant 0 : i32
    %c0_i32_0 = arith.constant 0 : i32
    %c0_i32_1 = arith.constant 0 : i32
    return %c0_i32, %c0_i32_0 : i32, i32
  }
}

</mosaic_0001>

<bundles_post_ra>
// kernel: tpu_custom_call.1
= control target key start
LH: loop header
LB: loop body
LE: loop exit
PB: predicated region body
PF: predicated region fallthrough
CT: control target
= control target key end

     0   :  { %13 = vsyncpa [#allocation3], 0  ;;  %s2042_s0 = inlined_call_operand.hbm [shape: f32[16,32], index: 0, kind: input, shape index: {}]   ;;  %s2043_s1 = inlined_call_operand.hbm [shape: f32[32,160], index: 1, kind: input, shape index: {}]   ;;  %s2044_s2 = inlined_call_operand.vmem [shape: f32[1,160], index: 2, kind: input, shape index: {}]   ;;  %s2045_s3 = inlined_call_operand.hbm [shape: f32[32,32], index: 3, kind: input, shape index: {}]   ;;  %s2046_s4 = inlined_call_operand.vmem [shape: f32[1,32], index: 4, kind: input, shape index: {}]   ;;  %s2047_s5 = inlined_call_operand.hbm [shape: f32[16,32], index: 5, kind: input, shape index: {}]   ;;  %s2048_s6 = inlined_call_operand.hbm [shape: f32[16,32], index: 6, kind: input, shape index: {}]   ;;  %s2049_s7 = inlined_call_operand.hbm [shape: f32[16,16], index: 7, kind: input, shape index: {}]   ;;  %s2050_s8 = inlined_call_operand.hbm [shape: f32[16,32], index: 8, kind: output, shape index: {}]  }
   0x1   :  { %14 = vsyncpa [#allocation6], 0 }
   0x2   :  { %15 = vsyncpa [#allocation9], 0 }
   0x3   :  { %16 = vsyncpa [#allocation12], 0 }
   0x4   :  { %17 = vsyncpa [#allocation4], 0  ;;  %s1793_s27 = smov [#allocation5]  }
   0x5   :  { %s35_s28 = sshll.u32 %s1793_s27, 4  ;;  %s36_s28 = int_to_ptr.vmem [resolvable:$true] %s35_s28 }
   0x6   :  { %s1651_s29 = scalar_lea.vmem %s36_s28, 1024  ;;  %p1656_p1 = scmp.lt.s32.totalorder %s36_s28, %s36_s28 }
   0x7   :  { %p1652_p0 = scmp.ne.s32.totalorder %s36_s28, %s1651_s29  ;;  %p1657_p2 = scmp.lt.s32.totalorder %s1651_s29, %s1651_s29 }
   0x9   :  { %p1658_p3 = por %p1657_p2, %p1656_p1 }
   0xb   :  { %p1659_p4 = pnand %p1658_p3, %p1652_p0 }
   0xd   :  { %1662 = shalt.err (!%p1659_p4)
}
   0xe   :  { %s1794_s30 = smov 256   ;;  %s1795_s9 = smov 16  }
   0xf   :  { %41 = dma.hbm_to_vmem [thread:$0]  %s2043_s1, 1024, %s36_s28, [#allocation6], %s1794_s30, %s1794_s30, %s1795_s9  }
  0x10   :  { %s1796_s12 = smov [#allocation8]   ;;  %s1797_s14 = smov [#allocation2]  }
  0x11   :  { %s63_s13 = sshll.u32 %s1796_s12, 4  ;;  %s23_s15 = sshll.u32 %s1797_s14, 4  ;;  %s64_s13 = int_to_ptr.vmem [resolvable:$true] %s63_s13  ;;  %s24_s15 = int_to_ptr.vmem [resolvable:$true] %s23_s15 }
  0x12   :  { %s1671_s16 = scalar_lea.vmem %s64_s13, 256  ;;  %p1676_p6 = scmp.lt.s32.totalorder %s64_s13, %s64_s13 }
  0x13   :  { %p1672_p5 = scmp.ne.s32.totalorder %s64_s13, %s1671_s16  ;;  %p1677_p7 = scmp.lt.s32.totalorder %s1671_s16, %s1671_s16 }
  0x15   :  { %p1678_p8 = por %p1677_p7, %p1676_p6 }
  0x17   :  { %p1679_p9 = pnand %p1678_p8, %p1672_p5 }
  0x19   :  { %1682 = shalt.err (!%p1679_p9)
}
  0x1a   :  { %s1798_s17 = smov 128   ;;  %s1799_s18 = smov 8  }
  0x1b   :  { %69 = dma.hbm_to_vmem [thread:$0]  %s2047_s5, 256, %s64_s13, [#allocation9], %s1798_s17, %s1798_s17, %s1799_s18  }
  0x1c   :  { %s1691_s1 = scalar_lea.vmem %s24_s15, 256  ;;  %p1696_p11 = scmp.lt.s32.totalorder %s24_s15, %s24_s15 }
  0x1d   :  { %p1692_p10 = scmp.ne.s32.totalorder %s24_s15, %s1691_s1  ;;  %p1697_p12 = scmp.lt.s32.totalorder %s1691_s1, %s1691_s1 }
  0x1f   :  { %p1698_p13 = por %p1697_p12, %p1696_p11 }
  0x21   :  { %p1699_p0 = pnand %p1698_p13, %p1692_p10 }
  0x23   :  { %1702 = shalt.err (!%p1699_p0)
}
  0x24   :  { %29 = dma.hbm_to_vmem [thread:$0]  %s2042_s0, 256, %s24_s15, [#allocation3], %s1798_s17, %s1798_s17, %s1799_s18  }
  0x25   :  { %s1800_s23 = smov [#allocation7]   ;;  %s1801_s25 = smov [#allocation10]  }
  0x26   :  { %s49_s24 = sshll.u32 %s1800_s23, 4  ;;  %s75_s5 = sshll.u32 %s1801_s25, 4  ;;  %s50_s24 = int_to_ptr.vmem [resolvable:$true] %s49_s24  ;;  %s76_s5 = int_to_ptr.vmem [resolvable:$true] %s75_s5 }
  0x27   :  { %s1711_s26 = scalar_lea.vmem %s50_s24, 512  ;;  %p1716_p2 = scmp.lt.s32.totalorder %s50_s24, %s50_s24 }
  0x28   :  { %p1712_p1 = scmp.ne.s32.totalorder %s50_s24, %s1711_s26  ;;  %p1717_p3 = scmp.lt.s32.totalorder %s1711_s26, %s1711_s26 }
  0x2a   :  { %p1718_p4 = por %p1717_p3, %p1716_p2 }
  0x2c   :  { %p1719_p5 = pnand %p1718_p4, %p1712_p1 }
  0x2e   :  { %1722 = shalt.err (!%p1719_p5)
}
  0x2f   :  { %55 = dma.hbm_to_vmem [thread:$0]  %s2045_s3, 512, %s50_s24, [#allocation6], %s1798_s17, %s1798_s17, %s1799_s18  }
  0x30   :  { %s1731_s0 = scalar_lea.vmem %s76_s5, 256  ;;  %p1736_p7 = scmp.lt.s32.totalorder %s76_s5, %s76_s5 }
  0x31   :  { %p1732_p6 = scmp.ne.s32.totalorder %s76_s5, %s1731_s0  ;;  %p1737_p8 = scmp.lt.s32.totalorder %s1731_s0, %s1731_s0 }
  0x33   :  { %p1738_p9 = por %p1737_p8, %p1736_p7 }
  0x35   :  { %p1739_p10 = pnand %p1738_p9, %p1732_p6 }
  0x37   :  { %1742 = shalt.err (!%p1739_p10)
}
  0x38   :  { %81 = dma.hbm_to_vmem [thread:$0]  %s2048_s6, 256, %s76_s5, [#allocation9], %s1798_s17, %s1798_s17, %s1799_s18  }
  0x39   :  { %s1802_s9 = smov [#allocation11]  }
  0x3a   :  { %s87_s10 = sshll.u32 %s1802_s9, 4  ;;  %s88_s10 = int_to_ptr.vmem [resolvable:$true] %s87_s10 }
  0x3b   :  { %s1751_s11 = scalar_lea.vmem %s88_s10, 256  ;;  %p1756_p12 = scmp.lt.s32.totalorder %s88_s10, %s88_s10 }
  0x3c   :  { %p1752_p11 = scmp.ne.s32.totalorder %s88_s10, %s1751_s11  ;;  %p1757_p13 = scmp.lt.s32.totalorder %s1751_s11, %s1751_s11 }
  0x3e   :  { %p1758_p0 = por %p1757_p13, %p1756_p12 }
  0x40   :  { %p1759_p1 = pnand %p1758_p0, %p1752_p11 }
  0x42   :  { %1762 = shalt.err (!%p1759_p1)
}
  0x43   :  { %93 = dma.hbm_to_vmem [thread:$0]  %s2049_s7, 256, %s88_s10, [#allocation12], %s1798_s17, %s1798_s17, %s1799_s18  }
  0x44   :  { %1783 = dma.done.wait [#allocation3], 256  }
  0x45   :  { %1784 = vsyncadd [#allocation3], 4294967040 }
  0x46   :  { %1785 = dma.done.wait [#allocation6], 1536  }
  0x47   :  { %1786 = vsyncadd [#allocation6], 4294965760 }
  0x48   :  { %1787 = dma.done.wait [#allocation9], 512  }
  0x49   :  { %1788 = vsyncadd [#allocation9], 4294966784 }
  0x4a   :  { %1789 = dma.done.wait [#allocation12], 256  }
  0x4b   :  { %1790 = vsyncadd [#allocation12], 4294967040  ;;  %v1803_v0 = vmov 0.0   ;;  %v121_v1 = vld [vmem:[#allocation5 + $0x38] sm:$0xff]  ;;  %v120_v2 = vld [vmem:[#allocation5 + $0x30] sm:$0xff]  ;;  %s1804_s6 = smov 96   ;;  %v124_v15 = vlaneseq }
  0x4c   :  { %205 = vmatprep.mubr.f32.mxu0 %v1803_v0  ;;  %v119_v3 = vld [vmem:[#allocation5 + $0x28] sm:$0xff]  ;;  %165 = vmatprep.subr.mxu0 %v121_v1  ;;  %v118_v4 = vld [vmem:[#allocation5 + $0x20] sm:$0xff]  ;;  %v117_v5 = vld [vmem:[#allocation5 + $0x18] sm:$0xff]  ;;  %s1805_s7 = smov 32   ;;  %vm134_vm0 = vcmask 261120   ;;  %s1806_s13 = smov 64  }
  0x4d   :  { %166 = vmatpush1.msra.mxu0 %v120_v2  ;;  %v116_v6 = vld [vmem:[#allocation5 + $0x10] sm:$0xff]  ;;  %v221_v7 = vld [vmem:[#allocation10 + $0x8] sm:$0xff]  ;;  %v115_v8 = vld [vmem:[#allocation5 + $0x8] sm:$0xff]  ;;  %v125_v16 = vshrl.u32 %v124_v15, 7  ;;  %vm280_vm1 = vcmask 64512   ;;  %s1808_s16 = smov 120  }
  0x4e   :  { %167 = vmatprep.subr.mxu0 %v119_v3  ;;  %256 = vrot.lane.b32.xlu0 %v221_v7, %s1804_s6  ;;  %v220_v9 = vld [vmem:[#allocation10] sm:$0xff]  ;;  %v114_v10 = vld [vmem:[#allocation5] sm:$0xff]  ;;  %v219_v12 = vld [vmem:[#allocation8 + $0x8] sm:$0xff]  ;;  %vm366_vm2 = vcmask 130048   ;;  %s1809_s19 = smov 48   ;;  %s1810_s20 = smov 112  }
  0x4f   :  { %168 = vmatpush1.msra.mxu0 %v118_v4  ;;  %226 = vrot.lane.b32.xlu1 %v220_v9, %s1805_s7  ;;  %v112_v11 = vld [vmem:[#allocation2] sm:$0xff]  ;;  %v113_v13 = vld [vmem:[#allocation2 + $0x8] sm:$0xff]  ;;  %v218_v14 = vld [vmem:[#allocation8] sm:$0xff]  ;;  %v126_v17 = vsub.s32 0, %v125_v16  ;;  %v130_v47 = vsub.s32 1, %v125_v16  ;;  %s1811_s1 = smov 40  }
  0x50   :  { %169 = vmatprep.subr.mxu0 %v117_v5  ;;  %v122_v18 = vld [vmem:[%s2044_s2] sm:$0x3]  ;;  %s1807_s2 = smov 56   ;;  %v1945_v58 = vld [vmem:[#allocation11 + $0x8] sm:$0xff]  ;;  %v1947_v60 = vld [vmem:[#allocation11] sm:$0xff]  ;;  %s1812_s21 = smov 104  }
  0x51   :  { %170 = vmatpush1.msra.mxu0 %v116_v6  ;;  %v127_v19 = vrot.slane %v122_v18, %v126_v17  ;;  %v131_v50 = vrot.slane %v122_v18, %v130_v47  ;;  %s1813_s24 = smov [#allocation13]  }
  0x52   :  { %171 = vmatprep.subr.mxu0 %v115_v8  ;;  %254 = vrot.lane.b32.xlu0 %v220_v9, %s1804_s6  ;;  %s1420_s25 = sshll.u32 %s1813_s24, 4  ;;  %s1421_s25 = int_to_ptr.vmem [resolvable:$true] %s1420_s25 }
  0x53   :  { %172 = vmatpush1.msra.mxu0 %v114_v10  ;;  %228 = vrot.lane.b32.xlu1 %v221_v7, %s1805_s7  ;;  %s1763_s5 = scalar_lea.vmem %s1421_s25, 256  ;;  %p1768_p3 = scmp.lt.s32.totalorder %s1421_s25, %s1421_s25 }
  0x54   :  { %1435 = vmatmul.mubr.msk.f32.vlgmr.msra.gmra.mxu0 %vm134_vm0, %v112_v11  ;;  %p1764_p2 = scmp.ne.s32.totalorder %s1421_s25, %s1763_s5  ;;  %p1769_p4 = scmp.lt.s32.totalorder %s1763_s5, %s1763_s5 }
  0x55   :  { %211 = vmatprep.mubr.f32.mxu0 %v1803_v0 }
  0x56   :  { %248 = vrot.lane.b32.xlu0 %v219_v12, %s1806_s13  ;;  %p1770_p5 = por %p1769_p4, %p1768_p3 }
  0x58   :  { %1436 = vmatmul.mubr.msk.f32.gmra.mxu0 %vm134_vm0, %v113_v13  ;;  %p1771_p6 = pnand %p1770_p5, %p1764_p2 }
  0x5a   :  { %246 = vrot.lane.b32.xlu0 %v218_v14, %s1806_s13 }
  0xc0   :  { %v257_v25 = vpop.permute.xlu0 %256 }
  0xc1   :  { %v227_v21 = vpop.permute.xlu1 %226 }
  0xc4   :  { %v255_v29 = vpop.permute.xlu0 %254 }
  0xc5   :  { %v229_v31 = vpop.permute.xlu1 %228 }
  0xc8   :  { %v249_v33 = vpop.permute.xlu0 %248 }
  0xcc   :  { %v247_v34 = vpop.permute.xlu0 %246 }
 0x114   :  { %v207_v20 = vpop.f32.mrf.mxu0 }
 0x115   :  { %v208_v22 = vadd.f32 %v207_v20, %v127_v19 }
 0x116   :  { %v209_v23 = vpop.f32.mrf.mxu0 }
 0x117   :  { %v232_v24 = vmul.f32 %v227_v21, %v208_v22  ;;  %v260_v30 = vmul.f32 %v255_v29, %v208_v22  ;;  %v222_v35 = vmul.f32 %v218_v14, %v208_v22  ;;  %v252_v41 = vmul.f32 %v247_v34, %v208_v22 }
 0x118   :  { %v213_v26 = vpop.f32.mrf.mxu0  ;;  %v1934_v56 = vadd.f32 %v209_v23, %v131_v50 }
 0x119   :  { %v214_v27 = vadd.f32 %v213_v26, %v127_v19  ;;  %236 = vrot.lane.b32.xlu0 %v232_v24, %s1804_s6 }
 0x11a   :  { %v215_v49 = vpop.f32.mrf.mxu0 }
 0x11b   :  { %v261_v28 = vmul.f32 %v257_v25, %v214_v27  ;;  %v233_v32 = vmul.f32 %v229_v31, %v214_v27  ;;  %v253_v38 = vmul.f32 %v249_v33, %v214_v27  ;;  %v223_v45 = vmul.f32 %v219_v12, %v214_v27 }
 0x11c   :  { %v1927_v53 = vadd.f32 %v215_v49, %v131_v50 }
 0x11d   :  { %266 = vrot.lane.b32.xlu1 %v261_v28, %s1804_s6  ;;  %v673_v28 = vld [vmem:[#allocation7 + $0x8] sm:$0xff] }
 0x121   :  { %264 = vrot.lane.b32.xlu1 %v260_v30, %s1804_s6 }
 0x125   :  { %238 = vrot.lane.b32.xlu1 %v233_v32, %s1804_s6 }
 0x18b   :  { %v237_v36 = vpop.permute.xlu0 %236 }
 0x18c   :  { %v1905_v37 = vadd.f32 %v237_v36, %v222_v35 }
 0x18e   :  { %1518 = vmatprep.mubr.msk.f32.mxu1 %vm280_vm1, %v1905_v37 }
 0x18f   :  { %v267_v39 = vpop.permute.xlu1 %266 }
 0x190   :  { %v1909_v40 = vadd.f32 %v267_v39, %v253_v38 }
 0x192   :  { %278 = vrot.lane.b32.xlu0 %v1909_v40, %s1806_s13 }
 0x193   :  { %v265_v42 = vpop.permute.xlu1 %264 }
 0x194   :  { %v1913_v43 = vadd.f32 %v265_v42, %v252_v41 }
 0x196   :  { %276 = vrot.lane.b32.xlu1 %v1913_v43, %s1806_s13  ;;  %477 = vrot.lane.b32.xlu0 %v1909_v40, %s1807_s2 }
 0x197   :  { %v239_v44 = vpop.permute.xlu1 %238 }
 0x198   :  { %v1921_v46 = vadd.f32 %v239_v44, %v223_v45  ;;  %v470_v44 = vld [vmem:[#allocation7] sm:$0xff] }
 0x19a   :  { %475 = vrot.lane.b32.xlu1 %v1913_v43, %s1807_s2  ;;  %471 = vrot.lane.b32.xlu0 %v1905_v37, %s1808_s16 }
 0x19e   :  { %473 = vrot.lane.b32.xlu1 %v1921_v46, %s1808_s16 }
 0x204   :  { %v279_v48 = vpop.permute.xlu0 %278 }
 0x205   :  { %1514 = vmatprep.subr.msk.mxu1 %vm280_vm1, %v279_v48 }
 0x206   :  { %1515 = vmatpush3.xpose.msk.msra.mxu1 %vm280_vm1, %v279_v48 }
 0x208   :  { %v277_v51 = vpop.permute.xlu1 %276  ;;  %v478_v52 = vpop.permute.xlu0 %477 }
 0x209   :  { %1516 = vmatprep.subr.msk.mxu1 %vm280_vm1, %v277_v51  ;;  %1528 = vmatprep.subr.msk.mxu0 %vm280_vm1, %v478_v52 }
 0x20a   :  { %1517 = vmatpush3.xpose.msk.msra.mxu1 %vm280_vm1, %v277_v51  ;;  %1529 = vmatpush3.xpose.msk.msra.mxu0 %vm280_vm1, %v478_v52 }
 0x20b   :  { %1521 = vmatprep.subr.mxu1 %v1927_v53 }
 0x20c   :  { %v476_v54 = vpop.permute.xlu1 %475  ;;  %v472_v55 = vpop.permute.xlu0 %471 }
 0x20d   :  { %1519 = vmatmul.mubr.msk.f32.vlgmr.msra.gmra.mxu1 %vm280_vm1, %v1921_v46  ;;  %1530 = vmatprep.subr.msk.mxu0 %vm280_vm1, %v476_v54 }
 0x20e   :  { %1532 = vmatprep.mubr.msk.f32.mxu0 %vm280_vm1, %v472_v55  ;;  %1522 = vmatpush3.msra.mxu1 %v1927_v53 }
 0x20f   :  { %1531 = vmatpush3.xpose.msk.msra.mxu0 %vm280_vm1, %v476_v54  ;;  %1523 = vmatprep.subr.mxu1 %v1934_v56 }
 0x210   :  { %v474_v57 = vpop.permute.xlu1 %473  ;;  %1524 = vmatpush3.msra.mxu1 %v1934_v56  ;;  %1542 = vmatprep.subr.mxu0 %v673_v28 }
 0x212   :  { %1533 = vmatmul.mubr.msk.f32.vlgmr.msra.gmra.mxu0 %vm280_vm1, %v474_v57 }
 0x213   :  { %1543 = vmatpush3.msra.mxu0 %v673_v28 }
 0x2cd   :  { %v1520_v59 = vpop.f32.mrf.mxu1 }
 0x2ce   :  { %v363_v61 = vadd.f32 %v1520_v59, %v1945_v58 }
 0x2cf   :  { %v357_v62 = vpop.f32.mrf.mxu1 }
 0x2d0   :  { %v358_v63 = vadd.f32 %v357_v62, %v1947_v60  ;;  %v370_v0 = vsel %vm366_vm2, %v363_v61, -inf }
 0x2d1   :  { %371 = vmax.xlane.f32.xlu1 %v370_v0 }
 0x2d2   :  { %v1534_v1 = vpop.f32.mrf.mxu0  ;;  %v367_v2 = vsel %vm366_vm2, %v358_v63, -inf }
 0x2d3   :  { %368 = vmax.xlane.f32.xlu0 %v367_v2  ;;  %v559_v5 = vadd.f32 %v1534_v1, %v1945_v58 }
 0x2d4   :  { %v553_v3 = vpop.f32.mrf.mxu0 }
 0x2d5   :  { %v554_v4 = vadd.f32 %v553_v3, %v1947_v60  ;;  %v565_v7 = vsel %vm366_vm2, %v559_v5, -inf }
 0x2d7   :  { %v562_v6 = vsel %vm366_vm2, %v554_v4, -inf }
 0x2d8   :  { %563 = vmax.xlane.f32.xlu0 %v562_v6 }
 0x2dc   :  { %566 = vmax.xlane.f32.xlu0 %v565_v7 }
 0x35a   :  { %v372_v8 = vpop.xlane.xlu1 %371 }
 0x35b   :  { %v374_v9 = vsub.f32 %v363_v61, %v372_v8 }
 0x35c   :  { %v369_v10 = vpop.xlane.xlu0 %368 }
 0x35d   :  { %v377_v11 = vmul.f32 1.442695, %v374_v9  ;;  %v373_v12 = vsub.f32 %v358_v63, %v369_v10 }
 0x35f   :  { %1611 = vpow2.f32 %v377_v11  ;;  %v375_v13 = vmul.f32 1.442695, %v373_v12 }
 0x361   :  { %1613 = vpow2.f32 %v375_v13  ;;  %v564_v14 = vpop.xlane.xlu0 %563 }
 0x362   :  { %v568_v15 = vsub.f32 %v554_v4, %v564_v14 }
 0x364   :  { %v570_v16 = vmul.f32 1.442695, %v568_v15 }
 0x365   :  { %v567_v17 = vpop.xlane.xlu0 %566 }
 0x366   :  { %1615 = vpow2.f32 %v570_v16  ;;  %v569_v18 = vsub.f32 %v559_v5, %v567_v17 }
 0x368   :  { %v572_v19 = vmul.f32 1.442695, %v569_v18 }
 0x36a   :  { %1617 = vpow2.f32 %v572_v19 }
 0x36c   :  { %v1612_v20 = vpop.eup %1611 }
 0x36d   :  { %v382_v21 = vsel %vm366_vm2, %v1612_v20, 0.0 }
 0x36e   :  { %v1614_v22 = vpop.eup %1613  ;;  %383 = vadd.xlane.f32.xlu0 %v382_v21 }
 0x36f   :  { %v379_v23 = vsel %vm366_vm2, %v1614_v22, 0.0 }
 0x370   :  { %380 = vadd.xlane.f32.xlu1 %v379_v23 }
 0x373   :  { %v1616_v24 = vpop.eup %1615 }
 0x374   :  { %v574_v25 = vsel %vm366_vm2, %v1616_v24, 0.0 }
 0x375   :  { %575 = vadd.xlane.f32.xlu1 %v574_v25 }
 0x377   :  { %v1618_v26 = vpop.eup %1617 }
 0x378   :  { %v577_v27 = vsel %vm366_vm2, %v1618_v26, 0.0 }
 0x379   :  { %578 = vadd.xlane.f32.xlu0 %v577_v27 }
 0x386   :  { %588 = vrot.lane.b32.xlu1 %v1927_v53, %s1808_s16 }
 0x38a   :  { %842 = vrot.lane.b32.xlu1 %v1909_v40, %s1809_s19 }
 0x38e   :  { %840 = vrot.lane.b32.xlu1 %v1913_v43, %s1809_s19 }
 0x38f   :  { %586 = vrot.lane.b32.xlu0 %v1934_v56, %s1808_s16 }
 0x392   :  { %838 = vrot.lane.b32.xlu1 %v1921_v46, %s1810_s20 }
 0x393   :  { %836 = vrot.lane.b32.xlu0 %v1905_v37, %s1810_s20 }
 0x396   :  { %1124 = vrot.lane.b32.xlu1 %v1913_v43, %s1811_s1 }
 0x397   :  { %1126 = vrot.lane.b32.xlu0 %v1909_v40, %s1811_s1 }
 0x39a   :  { %1122 = vrot.lane.b32.xlu1 %v1921_v46, %s1812_s21 }
 0x39b   :  { %1120 = vrot.lane.b32.xlu0 %v1905_v37, %s1812_s21 }
 0x3f7   :  { %v384_v29 = vpop.xlane.xlu0 %383 }
 0x3f8   :  { %1619 = vrcp.f32 %v384_v29 }
 0x3f9   :  { %v381_v30 = vpop.xlane.xlu1 %380 }
 0x3fa   :  { %1621 = vrcp.f32 %v381_v30  ;;  %v1036_v30 = vld [vmem:[#allocation7 + $0x10] sm:$0xff] }
 0x3fe   :  { %v576_v31 = vpop.xlane.xlu1 %575 }
 0x3ff   :  { %1623 = vrcp.f32 %v576_v31 }
 0x402   :  { %v589_v32 = vpop.permute.xlu1 %588  ;;  %v579_v33 = vpop.xlane.xlu0 %578 }
 0x403   :  { %1625 = vrcp.f32 %v579_v33  ;;  %1535 = vmatprep.subr.mxu1 %v589_v32 }
 0x405   :  { %v1620_v34 = vpop.eup %1619 }
 0x406   :  { %v843_v35 = vpop.permute.xlu1 %842  ;;  %v388_v39 = vmul.f32 %v1620_v34, %v1612_v20  ;;  %v587_v40 = vpop.permute.xlu0 %586 }
 0x407   :  { %v1622_v36 = vpop.eup %1621  ;;  %1552 = vmatprep.subr.msk.mxu0 %vm280_vm1, %v843_v35 }
 0x408   :  { %v387_v38 = vmul.f32 %v1622_v36, %v1614_v22 }
 0x40a   :  { %1525 = vmatprep.mubr.msk.f32.mxu1 %vm366_vm2, %v387_v38  ;;  %v837_v47 = vpop.permute.xlu0 %836  ;;  %v841_v49 = vpop.permute.xlu1 %840 }
 0x40b   :  { %1526 = vmatmul.mubr.msk.f32.vlgmr.msra.gmra.mxu1 %vm366_vm2, %v388_v39 }
 0x40c   :  { %v1624_v37 = vpop.eup %1623  ;;  %1536 = vmatpush3.msra.mxu1 %v589_v32 }
 0x40d   :  { %1537 = vmatprep.subr.mxu1 %v587_v40  ;;  %v582_v41 = vmul.f32 %v1624_v37, %v1616_v24 }
 0x40e   :  { %1538 = vmatpush3.msra.mxu1 %v587_v40  ;;  %v1127_v51 = vpop.permute.xlu0 %1126  ;;  %v839_v52 = vpop.permute.xlu1 %838 }
 0x40f   :  { %1539 = vmatprep.mubr.msk.f32.mxu1 %vm366_vm2, %v582_v41  ;;  %1547 = vmatprep.subr.mxu1 %v470_v44 }
 0x410   :  { %v1626_v42 = vpop.eup %1625 }
 0x411   :  { %v583_v43 = vmul.f32 %v1626_v42, %v1618_v26 }
 0x412   :  { %v1121_v54 = vpop.permute.xlu0 %1120  ;;  %v1125_v55 = vpop.permute.xlu1 %1124 }
 0x413   :  { %1540 = vmatmul.mubr.msk.f32.vlgmr.msra.gmra.mxu1 %vm366_vm2, %v583_v43 }
 0x414   :  { %1548 = vmatpush3.msra.mxu1 %v470_v44 }
 0x416   :  { %v1123_v57 = vpop.permute.xlu1 %1122 }
 0x4cb   :  { %v1527_v45 = vpop.f32.mrf.mxu1 }
 0x4cd   :  { %v461_v46 = vpop.f32.mrf.mxu1 }
 0x4ce   :  { %1549 = vmatprep.mubr.msk.f32.mxu1 %vm280_vm1, %v461_v46 }
 0x4cf   :  { %1550 = vmatmul.mubr.msk.f32.vlgmr.msra.gmra.mxu1 %vm280_vm1, %v1527_v45 }
 0x4d3   :  { %v1541_v48 = vpop.f32.mrf.mxu1 }
 0x4d5   :  { %v664_v50 = vpop.f32.mrf.mxu1 }
 0x4d6   :  { %1544 = vmatprep.mubr.msk.f32.mxu0 %vm280_vm1, %v664_v50 }
 0x4d7   :  { %1545 = vmatmul.mubr.msk.f32.vlgmr.msra.gmra.mxu0 %vm280_vm1, %v1541_v48  ;;  %v1320_v48 = vld [vmem:[#allocation7 + $0x18] sm:$0xff] }
 0x4d8   :  { %1553 = vmatpush3.xpose.msk.msra.mxu0 %vm280_vm1, %v843_v35  ;;  %1556 = vmatprep.mubr.msk.f32.mxu0 %vm280_vm1, %v837_v47 }
 0x4d9   :  { %1554 = vmatprep.subr.msk.mxu0 %vm280_vm1, %v841_v49 }
 0x4dc   :  { %1555 = vmatpush3.xpose.msk.msra.mxu0 %vm280_vm1, %v841_v49 }
 0x4dd   :  { %1571 = vmatprep.subr.msk.mxu0 %vm280_vm1, %v1127_v51 }
 0x4df   :  { %1557 = vmatmul.mubr.msk.f32.vlgmr.msra.gmra.mxu0 %vm280_vm1, %v839_v52 }
 0x4e0   :  { %1572 = vmatpush3.xpose.msk.msra.mxu0 %vm280_vm1, %v1127_v51  ;;  %1575 = vmatprep.mubr.msk.f32.mxu0 %vm280_vm1, %v1121_v54 }
 0x4e1   :  { %1573 = vmatprep.subr.msk.mxu0 %vm280_vm1, %v1125_v55 }
 0x4e4   :  { %1574 = vmatpush3.xpose.msk.msra.mxu0 %vm280_vm1, %v1125_v55 }
 0x4e7   :  { %1576 = vmatmul.mubr.msk.f32.vlgmr.msra.gmra.mxu0 %vm280_vm1, %v1123_v57 }
 0x58f   :  { %v1551_v59 = vpop.f32.mrf.mxu1 }
 0x591   :  { %v827_v40 = vpop.f32.mrf.mxu1 }
 0x597   :  { %v1546_v61 = vpop.f32.mrf.mxu0 }
 0x598   :  { %v1997_v62 = vadd.f32 %v1551_v59, %v1546_v61  ;;  %v1469_v61 = vld [vmem:[%s2046_s4] ss:$0 sm:$0xff] }
 0x599   :  { %v1999_v63 = vpop.f32.mrf.mxu0 }
 0x59a   :  { %v828_v50 = vadd.f32 %v827_v40, %v1999_v63 }
 0x59f   :  { %v1558_v0 = vpop.f32.mrf.mxu0 }
 0x5a0   :  { %v924_v1 = vadd.f32 %v1558_v0, %v1945_v58 }
 0x5a1   :  { %v918_v2 = vpop.f32.mrf.mxu0 }
 0x5a2   :  { %v919_v3 = vadd.f32 %v918_v2, %v1947_v60  ;;  %v930_v4 = vsel %vm366_vm2, %v924_v1, -inf }
 0x5a3   :  { %931 = vmax.xlane.f32.xlu1 %v930_v4 }
 0x5a4   :  { %v927_v5 = vsel %vm366_vm2, %v919_v3, -inf }
 0x5a5   :  { %928 = vmax.xlane.f32.xlu0 %v927_v5 }
 0x5a7   :  { %v1577_v6 = vpop.f32.mrf.mxu0 }
 0x5a8   :  { %v1208_v24 = vadd.f32 %v1577_v6, %v1945_v58 }
 0x5a9   :  { %v1202_v7 = vpop.f32.mrf.mxu0 }
 0x5aa   :  { %v1203_v8 = vadd.f32 %v1202_v7, %v1947_v60  ;;  %v1214_v26 = vsel %vm366_vm2, %v1208_v24, -inf }
 0x5ac   :  { %v1211_v9 = vsel %vm366_vm2, %v1203_v8, -inf }
 0x5b4   :  { %951 = vrot.lane.b32.xlu1 %v1927_v53, %s1810_s20 }
 0x5d8   :  { %1212 = vmax.xlane.f32.xlu1 %v1211_v9 }
 0x62c   :  { %v932_v10 = vpop.xlane.xlu1 %931 }
 0x62d   :  { %v934_v11 = vsub.f32 %v924_v1, %v932_v10 }
 0x62e   :  { %v929_v12 = vpop.xlane.xlu0 %928 }
 0x62f   :  { %v937_v13 = vmul.f32 1.442695, %v934_v11  ;;  %v933_v14 = vsub.f32 %v919_v3, %v929_v12 }
 0x630   :  { %v952_v15 = vpop.permute.xlu1 %951 }
 0x631   :  { %1627 = vpow2.f32 %v937_v13  ;;  %v935_v16 = vmul.f32 1.442695, %v933_v14  ;;  %1559 = vmatprep.subr.mxu1 %v952_v15 }
 0x632   :  { %1560 = vmatpush3.msra.mxu1 %v952_v15 }
 0x633   :  { %1629 = vpow2.f32 %v935_v16 }
 0x63e   :  { %v1628_v17 = vpop.eup %1627 }
 0x63f   :  { %v942_v18 = vsel %vm366_vm2, %v1628_v17, 0.0 }
 0x640   :  { %v1630_v19 = vpop.eup %1629  ;;  %943 = vadd.xlane.f32.xlu0 %v942_v18 }
 0x641   :  { %v939_v60 = vsel %vm366_vm2, %v1630_v19, 0.0 }
 0x644   :  { %940 = vadd.xlane.f32.xlu0 %v939_v60 }
 0x65a   :  { %949 = vrot.lane.b32.xlu0 %v1934_v56, %s1810_s20 }
 0x661   :  { %v1213_v20 = vpop.xlane.xlu1 %1212 }
 0x662   :  { %v1217_v21 = vsub.f32 %v1203_v8, %v1213_v20 }
 0x664   :  { %v1219_v22 = vmul.f32 1.442695, %v1217_v21 }
 0x666   :  { %1631 = vpow2.f32 %v1219_v22 }
 0x673   :  { %v1632_v23 = vpop.eup %1631 }
 0x674   :  { %v1223_v25 = vsel %vm366_vm2, %v1632_v23, 0.0 }
 0x675   :  { %1224 = vadd.xlane.f32.xlu1 %v1223_v25 }
 0x679   :  { %1215 = vmax.xlane.f32.xlu0 %v1214_v26 }
 0x686   :  { %1235 = vrot.lane.b32.xlu1 %v1927_v53, %s1812_s21 }
 0x6c9   :  { %v944_v27 = vpop.xlane.xlu0 %943 }
 0x6ca   :  { %1633 = vrcp.f32 %v944_v27 }
 0x6cd   :  { %v941_v28 = vpop.xlane.xlu0 %940 }
 0x6ce   :  { %1635 = vrcp.f32 %v941_v28 }
 0x6d1   :  { %v950_v29 = vpop.permute.xlu0 %949 }
 0x6d2   :  { %1561 = vmatprep.subr.mxu1 %v950_v29 }
 0x6d3   :  { %1562 = vmatpush3.msra.mxu1 %v950_v29 }
 0x6d4   :  { %1566 = vmatprep.subr.mxu1 %v1036_v30 }
 0x6d7   :  { %v1634_v31 = vpop.eup %1633 }
 0x6d8   :  { %v948_v33 = vmul.f32 %v1634_v31, %v1628_v17 }
 0x6db   :  { %v1636_v58 = vpop.eup %1635 }
 0x6dc   :  { %v947_v32 = vmul.f32 %v1636_v58, %v1630_v19 }
 0x6de   :  { %1563 = vmatprep.mubr.msk.f32.mxu1 %vm366_vm2, %v947_v32 }
 0x6df   :  { %1564 = vmatmul.mubr.msk.f32.vlgmr.msra.gmra.mxu1 %vm366_vm2, %v948_v33 }
 0x6e0   :  { %1567 = vmatpush3.msra.mxu1 %v1036_v30 }
 0x6fe   :  { %v1225_v34 = vpop.xlane.xlu1 %1224 }
 0x702   :  { %v1236_v53 = vpop.permute.xlu1 %1235  ;;  %v1216_v35 = vpop.xlane.xlu0 %1215 }
 0x703   :  { %v1218_v36 = vsub.f32 %v1208_v24, %v1216_v35  ;;  %1578 = vmatprep.subr.mxu1 %v1236_v53 }
 0x705   :  { %v1221_v38 = vmul.f32 1.442695, %v1218_v36 }
 0x707   :  { %1637 = vpow2.f32 %v1221_v38 }
 0x708   :  { %1639 = vrcp.f32 %v1225_v34 }
 0x714   :  { %v1638_v39 = vpop.eup %1637 }
 0x715   :  { %v1226_v37 = vsel %vm366_vm2, %v1638_v39, 0.0  ;;  %v1640_v41 = vpop.eup %1639 }
 0x716   :  { %1227 = vadd.xlane.f32.xlu0 %v1226_v37  ;;  %v1231_v45 = vmul.f32 %v1640_v41, %v1632_v23 }
 0x72c   :  { %1233 = vrot.lane.b32.xlu0 %v1934_v56, %s1812_s21 }
 0x79f   :  { %v1565_v42 = vpop.f32.mrf.mxu1  ;;  %v1228_v43 = vpop.xlane.xlu0 %1227 }
 0x7a0   :  { %1641 = vrcp.f32 %v1228_v43 }
 0x7a1   :  { %v1027_v44 = vpop.f32.mrf.mxu1 }
 0x7a2   :  { %1568 = vmatprep.mubr.msk.f32.mxu1 %vm280_vm1, %v1027_v44 }
 0x7a3   :  { %1569 = vmatmul.mubr.msk.f32.vlgmr.msra.gmra.mxu1 %vm280_vm1, %v1565_v42  ;;  %v1234_v46 = vpop.permute.xlu0 %1233 }
 0x7a4   :  { %1579 = vmatpush3.msra.mxu1 %v1236_v53  ;;  %1582 = vmatprep.mubr.msk.f32.mxu1 %vm366_vm2, %v1231_v45 }
 0x7a5   :  { %1580 = vmatprep.subr.mxu1 %v1234_v46 }
 0x7a6   :  { %1581 = vmatpush3.msra.mxu1 %v1234_v46 }
 0x7a7   :  { %1585 = vmatprep.subr.mxu1 %v1320_v48 }
 0x7ad   :  { %v1642_v47 = vpop.eup %1641 }
 0x7ae   :  { %v1232_v56 = vmul.f32 %v1642_v47, %v1638_v39 }
 0x7b0   :  { %1583 = vmatmul.mubr.msk.f32.vlgmr.msra.gmra.mxu1 %vm366_vm2, %v1232_v56 }
 0x7b1   :  { %1586 = vmatpush3.msra.mxu1 %v1320_v48 }
 0x863   :  { %v1570_v49 = vpop.f32.mrf.mxu1 }
 0x864   :  { %v1119_v51 = vadd.f32 %v1570_v49, %v1997_v62 }
 0x865   :  { %v1109_v52 = vpop.f32.mrf.mxu1 }
 0x866   :  { %v1118_v54 = vadd.f32 %v1109_v52, %v828_v50 }
 0x870   :  { %v1584_v55 = vpop.f32.mrf.mxu1 }
 0x872   :  { %v1311_v57 = vpop.f32.mrf.mxu1 }
 0x873   :  { %1587 = vmatprep.mubr.msk.f32.mxu1 %vm280_vm1, %v1311_v57 }
 0x874   :  { %1588 = vmatmul.mubr.msk.f32.vlgmr.msra.gmra.mxu1 %vm280_vm1, %v1584_v55 }
 0x934   :  { %v1589_v59 = vpop.f32.mrf.mxu1 }
 0x935   :  { %v1403_v0 = vadd.f32 %v1589_v59, %v1119_v51 }
 0x936   :  { %v1393_v1 = vpop.f32.mrf.mxu1 }
 0x937   :  { %v1412_v63 = vadd.f32 %v1469_v61, %v1403_v0  ;;  %v1402_v2 = vadd.f32 %v1393_v1, %v1118_v54 }
 0x939   :  { %1414 = vst.msk [vmem:[#allocation13 + $0x8] sm:$0xff] %vm134_vm0, %v1412_v63  ;;  %v1411_v62 = vadd.f32 %v1469_v61, %v1402_v2 }
 0x93b   :  { %1413 = vst.msk [vmem:[#allocation13] sm:$0xff] %vm134_vm0, %v1411_v62 }
 0x93c   :  { %1774 = shalt.err (!%p1771_p6)
}
 0x93d   :  { %1426 = dma.vmem_to_hbm [thread:$0]  %s1421_s25, 256, %s2050_s8, [#allocation4], %s1798_s17, %s1798_s17, %s1799_s18  }
 0x93e   :  { %1791 = dma.done.wait [#allocation4], 256  }
 0x93f   :  { %1792 = vsyncadd [#allocation4], 4294967040 }
 0x940   :  { %1430 = vsyncpa [#allocation3], 1 }
 0x941   :  { %1431 = vsyncpa [#allocation6], 1 }
 0x942   :  { %1432 = vsyncpa [#allocation9], 1 }
 0x943   :  { %1433 = vsyncpa [#allocation12], 1 }
 0x944   :  { %1434 = vsyncpa [#allocation4], 1 }

</bundles_post_ra>
